<compile_context>
chip_gen: v7x
topology: tpu7x:2x2x1
jax: 0.10.0
libtpu: 0.0.40
codegen_flags: <defaults>
</compile_context>

<pallas_src>
import functools

import jax
import jax.numpy as jnp
import numpy as np
from jax import lax
from jax.experimental import pallas as pl
from jax.experimental.pallas import tpu as pltpu


def _decoder_kernel(x_ref, w1_ref, b1_ref, w2_ref, b2_ref, out_ref, acc_ref, *,
                    seq_len, tile_rows, tiles_per_split):
    c = pl.program_id(0)          # split axis ("parallel": one per TC on v7x)
    j = pl.program_id(1)          # row-tile within the split ("arbitrary": reduction)

    @pl.when(j == 0)
    def _init():
        acc_ref[...] = jnp.zeros_like(acc_ref)

    x = x_ref[...]                                                     # (tile, 29) f32
    h = jnp.dot(x, w1_ref[...], preferred_element_type=jnp.float32) + b1_ref[...]
    h = jnp.maximum(h, 0.0)                                            # (tile, 15)
    h = jnp.dot(h, w2_ref[...], preferred_element_type=jnp.float32) + b2_ref[...]
    h = jnp.maximum(h, 0.0)                                            # (tile, 8)

    logical_tile = c * tiles_per_split + j
    row_base = logical_tile * tile_rows
    needs_mask = row_base + tile_rows > seq_len        # partial / over-hanging tile

    @pl.when(jnp.logical_not(needs_mask))
    def _acc_full():
        acc_ref[...] += jnp.sum(h, axis=0, keepdims=True)              # (1, 8)

    @pl.when(needs_mask)
    def _acc_masked():
        # Rows beyond seq_len hold unspecified data -> select them out before sum.
        row = row_base + lax.broadcasted_iota(jnp.int32, (tile_rows, 1), 0)
        acc_ref[...] += jnp.sum(jnp.where(row < seq_len, h, 0.0),
                                axis=0, keepdims=True)

    # Output block is resident across j; HBM writeback happens once per split.
    out_ref[...] = acc_ref[...]


def decoder_forward(x, params, *, tile_rows=4096):
    """x: (B, S, 29) float32. Returns shape (1,) == torch `mean(x, dim=1)[0]`."""
    B, S, F = x.shape
    w1, b1, w2, b2, w3, b3 = params
    x = x.astype(jnp.float32)

    # Tile selection: large tiles amortize per-step pipeline overhead; tiny-S
    # falls back to a single full-extent block (no mask, no pad needed).
    if S >= tile_rows:
        tile = int(tile_rows)                  # multiple of 512, 8-aligned
    else:
        tile = S                               # full-dim block satisfies tiling rule

    n_tiles = (S + tile - 1) // tile
    # Split the row reduction across a leading "parallel" axis so v7x's two
    # TensorCores each take half; negligible cost on single-TC v5e/v6e.
    num_splits = 2 if n_tiles >= 2 else 1
    tps = (n_tiles + num_splits - 1) // num_splits     # tiles per split

    kernel = functools.partial(_decoder_kernel, seq_len=S, tile_rows=tile,
                               tiles_per_split=tps)

    def x_index_map(c, j):
        # Clamp: an over-hanging tile of the last split re-reads the final valid
        # block; all of its rows are >= S so they are masked to zero in-kernel.
        return (0, jnp.minimum(c * tps + j, n_tiles - 1), 0)

    def full_spec(arr):
        return pl.BlockSpec(arr.shape, lambda c, j: (0, 0))

    flops = 2 * S * (F * 15 + 15 * 8)
    bytes_accessed = S * F * 4 + 4 * (F * 15 + 15 + 15 * 8 + 8) + num_splits * 8 * 4

    partials = pl.pallas_call(
        kernel,
        out_shape=jax.ShapeDtypeStruct((num_splits, 1, 8), jnp.float32),
        grid_spec=pltpu.PrefetchScalarGridSpec(
            num_scalar_prefetch=0,
            grid=(num_splits, tps),
            in_specs=[
                # Stream batch element 0 straight out of the full (B, S, F) array
                # (no host-side slice / pad materialization).
                pl.BlockSpec((pl.Squeezed(), tile, F), x_index_map),
                full_spec(w1), full_spec(b1),
                full_spec(w2), full_spec(b2),
            ],
            out_specs=pl.BlockSpec((pl.Squeezed(), 1, 8), lambda c, j: (c, 0, 0)),
            scratch_shapes=[pltpu.VMEM((1, 8), jnp.float32)],   # sum_S(h2) per split
        ),
        compiler_params=pltpu.CompilerParams(
            dimension_semantics=("parallel", "arbitrary"),
        ),
        cost_estimate=pl.CostEstimate(
            flops=flops, transcendentals=0, bytes_accessed=bytes_accessed),
    )(x, w1, b1, w2, b2)

    # mean_S(h2 @ w3 + b3) == mean_S(h2) @ w3 + b3   (tiny 8->1 epilogue on host).
    mean_h = jnp.sum(partials.reshape(num_splits, 8), axis=0) * (1.0 / S)   # (8,)
    out = jnp.dot(mean_h, w3) + b3.reshape(-1)                              # (1,)
    return out


def init_params(key):
    """Deterministic PyTorch-Linear-style init: U(-1/sqrt(fan_in), 1/sqrt(fan_in))."""
    def linear(k, fan_in, fan_out):
        kw, kb = jax.random.split(k)
        bound = 1.0 / np.sqrt(fan_in)
        w = jax.random.uniform(kw, (fan_in, fan_out), jnp.float32, -bound, bound)
        b = jax.random.uniform(kb, (1, fan_out), jnp.float32, -bound, bound)
        return w, b

    k1, k2, k3 = jax.random.split(key, 3)
    w1, b1 = linear(k1, 29, 15)
    w2, b2 = linear(k2, 15, 8)
    w3, b3 = linear(k3, 8, 1)
    return (w1, b1, w2, b2, w3, b3)


def reference_forward(x, params):
    w1, b1, w2, b2, w3, b3 = params
    h = jax.nn.relu(x @ w1 + b1)
    h = jax.nn.relu(h @ w2 + b2)
    y = h @ w3 + b3                      # (B, S, 1)
    return jnp.mean(y, axis=1)[0]        # (1,)


if __name__ == "__main__":
    key = jax.random.PRNGKey(0)
    kx, kx2, kp = jax.random.split(key, 3)
    params = init_params(kp)

    # Small shape consistent with the module spec.
    B, S, F = 2, 8, 29
    x = jax.random.normal(kx, (B, S, F), dtype=jnp.float32)
    out = jax.block_until_ready(decoder_forward(x, params))
    ref = jax.block_until_ready(reference_forward(x, params))
    assert out.shape == (1,), out.shape
    np.testing.assert_allclose(np.asarray(out), np.asarray(ref),
                               rtol=1e-5, atol=1e-5)

    # Larger, non-divisible S with a small forced tile: exercises the multi-tile,
    # two-split, clamped-overhang and masked-tail code paths.
    S2 = 1100
    x2 = jax.random.normal(kx2, (B, S2, F), dtype=jnp.float32)
    out2 = jax.block_until_ready(decoder_forward(x2, params, tile_rows=256))
    ref2 = jax.block_until_ready(reference_forward(x2, params))
    assert out2.shape == (1,), out2.shape
    np.testing.assert_allclose(np.asarray(out2), np.asarray(ref2),
                               rtol=1e-4, atol=1e-5)

    print("KERNEL_OK")
</pallas_src>

<mosaic_0001>
module attributes {stable_mosaic.version = 11 : i64} {
  func.func @_decoder_kernel(%arg0: i32, %arg1: i32, %arg2: memref<1x8x29xf32, #tpu.memory_space<vmem>>, %arg3: memref<29x15xf32, #tpu.memory_space<vmem>>, %arg4: memref<1x15xf32, #tpu.memory_space<vmem>>, %arg5: memref<15x8xf32, #tpu.memory_space<vmem>>, %arg6: memref<1x8xf32, #tpu.memory_space<vmem>>, %arg7: memref<1x1x8xf32, #tpu.memory_space<vmem>>, %arg8: memref<1x8xf32, #tpu.memory_space<vmem>>) attributes {dimension_semantics = [#tpu.dimension_semantics<parallel>, #tpu.dimension_semantics<arbitrary>], iteration_bounds = array<i64: 1, 1>, scalar_prefetch = 0 : i64, scratch_operands = 1 : i64, tpu.core_type = #tpu.core_type<tc>, window_params = [{transform_indices = @transform_0, window_bounds = array<i64: 1, 8, 29>}, {pipeline_mode = #tpu.pipeline_mode<synchronous>, transform_indices = @transform_1, window_bounds = array<i64: 29, 15>}, {pipeline_mode = #tpu.pipeline_mode<synchronous>, transform_indices = @transform_2, window_bounds = array<i64: 1, 15>}, {pipeline_mode = #tpu.pipeline_mode<synchronous>, transform_indices = @transform_3, window_bounds = array<i64: 15, 8>}, {pipeline_mode = #tpu.pipeline_mode<synchronous>, transform_indices = @transform_4, window_bounds = array<i64: 1, 8>}, {transform_indices = @transform_5, window_bounds = array<i64: 1, 1, 8>}]} {
    %c0_i32 = arith.constant 0 : i32
    %0 = arith.cmpi eq, %arg1, %c0_i32 : i32
    %1 = arith.extui %0 : i1 to i32
    %c0_i32_0 = arith.constant 0 : i32
    %2 = arith.cmpi ne, %1, %c0_i32_0 : i32
    scf.if %2 {
      %cst_23 = arith.constant 0.000000e+00 : f32
      %33 = vector.broadcast %cst_23 : f32 to vector<1x8xf32>
      %c0_24 = arith.constant 0 : index
      %c0_25 = arith.constant 0 : index
      %34 = vector.load %arg8[%c0_24, %c0_25] : memref<1x8xf32, #tpu.memory_space<vmem>>, vector<1x8xf32>
      tpu.vector_store %arg8[%c0_24, %c0_25], %33 {strides = array<i32>} : memref<1x8xf32, #tpu.memory_space<vmem>>, vector<1x8xf32>,
    } else {
    }
    %c0 = arith.constant 0 : index
    %c0_1 = arith.constant 0 : index
    %c0_2 = arith.constant 0 : index
    %3 = vector.load %arg2[%c0, %c0_1, %c0_2] : memref<1x8x29xf32, #tpu.memory_space<vmem>>, vector<1x8x29xf32>
    %4 = vector.shape_cast %3 : vector<1x8x29xf32> to vector<8x29xf32>
    %c0_3 = arith.constant 0 : index
    %c0_4 = arith.constant 0 : index
    %5 = vector.load %arg3[%c0_3, %c0_4] : memref<29x15xf32, #tpu.memory_space<vmem>>, vector<29x15xf32>
    %cst = arith.constant dense<0.000000e+00> : vector<8x15xf32>
    %6 = tpu.matmul %4, %5, %cst {dimension_numbers = #tpu.dot_dimension_numbers<[1], [0], [0], [1], [0, 0, 1, 1], [], []>} : vector<8x29xf32>, vector<29x15xf32>, vector<8x15xf32> -> vector<8x15xf32>
    %c0_5 = arith.constant 0 : index
    %c0_6 = arith.constant 0 : index
    %7 = vector.load %arg4[%c0_5, %c0_6] : memref<1x15xf32, #tpu.memory_space<vmem>>, vector<1x15xf32>
    %8 = vector.broadcast %7 : vector<1x15xf32> to vector<8x15xf32>
    %9 = arith.addf %6, %8 : vector<8x15xf32>
    %cst_7 = arith.constant 0.000000e+00 : f32
    %10 = vector.broadcast %cst_7 : f32 to vector<8x15xf32>
    %11 = arith.maximumf %9, %10 : vector<8x15xf32>
    %c0_8 = arith.constant 0 : index
    %c0_9 = arith.constant 0 : index
    %12 = vector.load %arg5[%c0_8, %c0_9] : memref<15x8xf32, #tpu.memory_space<vmem>>, vector<15x8xf32>
    %cst_10 = arith.constant dense<0.000000e+00> : vector<8x8xf32>
    %13 = tpu.matmul %11, %12, %cst_10 {dimension_numbers = #tpu.dot_dimension_numbers<[1], [0], [0], [1], [0, 0, 1, 1], [], []>} : vector<8x15xf32>, vector<15x8xf32>, vector<8x8xf32> -> vector<8x8xf32>
    %c0_11 = arith.constant 0 : index
    %c0_12 = arith.constant 0 : index
    %14 = vector.load %arg6[%c0_11, %c0_12] : memref<1x8xf32, #tpu.memory_space<vmem>>, vector<1x8xf32>
    %15 = vector.broadcast %14 : vector<1x8xf32> to vector<8x8xf32>
    %16 = arith.addf %13, %15 : vector<8x8xf32>
    %cst_13 = arith.constant 0.000000e+00 : f32
    %17 = vector.broadcast %cst_13 : f32 to vector<8x8xf32>
    %18 = arith.maximumf %16, %17 : vector<8x8xf32>
    %c1_i32 = arith.constant 1 : i32
    %19 = arith.muli %arg0, %c1_i32 : i32
    %20 = arith.addi %19, %arg1 : i32
    %c8_i32 = arith.constant 8 : i32
    %21 = arith.muli %20, %c8_i32 : i32
    %c8_i32_14 = arith.constant 8 : i32
    %22 = arith.addi %21, %c8_i32_14 : i32
    %c8_i32_15 = arith.constant 8 : i32
    %23 = arith.cmpi sgt, %22, %c8_i32_15 : i32
    %true = arith.constant true
    %24 = arith.xori %23, %true : i1
    %25 = arith.extui %24 : i1 to i32
    %c0_i32_16 = arith.constant 0 : i32
    %26 = arith.cmpi ne, %25, %c0_i32_16 : i32
    scf.if %26 {
      %c0_23 = arith.constant 0 : index
      %c0_24 = arith.constant 0 : index
      %33 = vector.load %arg8[%c0_23, %c0_24] : memref<1x8xf32, #tpu.memory_space<vmem>>, vector<1x8xf32>
      %cst_25 = arith.constant dense<0.000000e+00> : vector<8xf32>
      %34 = vector.multi_reduction <add>, %18, %cst_25 [0] : vector<8x8xf32> to vector<8xf32>
      %35 = vector.shape_cast %34 : vector<8xf32> to vector<1x8xf32>
      %36 = arith.addf %33, %35 : vector<1x8xf32>
      %c0_26 = arith.constant 0 : index
      %c0_27 = arith.constant 0 : index
      %37 = vector.load %arg8[%c0_26, %c0_27] : memref<1x8xf32, #tpu.memory_space<vmem>>, vector<1x8xf32>
      tpu.vector_store %arg8[%c0_26, %c0_27], %36 {strides = array<i32>} : memref<1x8xf32, #tpu.memory_space<vmem>>, vector<1x8xf32>,
    } else {
    }
    %27 = arith.extui %23 : i1 to i32
    %c0_i32_17 = arith.constant 0 : i32
    %28 = arith.cmpi ne, %27, %c0_i32_17 : i32
    scf.if %28 {
      %33 = tpu.iota {dimensions = array<i32: 0>} : vector<8x1xi32>
      %34 = vector.broadcast %21 : i32 to vector<8x1xi32>
      %35 = arith.addi %34, %33 : vector<8x1xi32>
      %c0_23 = arith.constant 0 : index
      %c0_24 = arith.constant 0 : index
      %36 = vector.load %arg8[%c0_23, %c0_24] : memref<1x8xf32, #tpu.memory_space<vmem>>, vector<1x8xf32>
      %c8_i32_25 = arith.constant 8 : i32
      %37 = vector.broadcast %c8_i32_25 : i32 to vector<8x1xi32>
      %38 = arith.cmpi slt, %35, %37 : vector<8x1xi32>
      %cst_26 = arith.constant 0.000000e+00 : f32
      %39 = vector.shape_cast %38 : vector<8x1xi1> to vector<8x1xi1>
      %40 = vector.broadcast %39 : vector<8x1xi1> to vector<8x8xi1>
      %41 = vector.broadcast %cst_26 : f32 to vector<8x8xf32>
      %42 = arith.select %40, %18, %41 : vector<8x8xi1>, vector<8x8xf32>
      %cst_27 = arith.constant dense<0.000000e+00> : vector<8xf32>
      %43 = vector.multi_reduction <add>, %42, %cst_27 [0] : vector<8x8xf32> to vector<8xf32>
      %44 = vector.shape_cast %43 : vector<8xf32> to vector<1x8xf32>
      %45 = arith.addf %36, %44 : vector<1x8xf32>
      %c0_28 = arith.constant 0 : index
      %c0_29 = arith.constant 0 : index
      %46 = vector.load %arg8[%c0_28, %c0_29] : memref<1x8xf32, #tpu.memory_space<vmem>>, vector<1x8xf32>
      tpu.vector_store %arg8[%c0_28, %c0_29], %45 {strides = array<i32>} : memref<1x8xf32, #tpu.memory_space<vmem>>, vector<1x8xf32>,
    } else {
    }
    %c0_18 = arith.constant 0 : index
    %c0_19 = arith.constant 0 : index
    %29 = vector.load %arg8[%c0_18, %c0_19] : memref<1x8xf32, #tpu.memory_space<vmem>>, vector<1x8xf32>
    %c0_20 = arith.constant 0 : index
    %c0_21 = arith.constant 0 : index
    %c0_22 = arith.constant 0 : index
    %30 = vector.load %arg7[%c0_20, %c0_21, %c0_22] : memref<1x1x8xf32, #tpu.memory_space<vmem>>, vector<1x1x8xf32>
    %31 = vector.shape_cast %30 : vector<1x1x8xf32> to vector<1x8xf32>
    %32 = vector.shape_cast %29 : vector<1x8xf32> to vector<1x1x8xf32>
    tpu.vector_store %arg7[%c0_20, %c0_21, %c0_22], %32 {strides = array<i32>} : memref<1x1x8xf32, #tpu.memory_space<vmem>>, vector<1x1x8xf32>,
    return
  }
  func.func @transform_0(%arg0: i32, %arg1: i32) -> (i32, i32, i32) {
    %c1_i32 = arith.constant 1 : i32
    %0 = arith.muli %arg0, %c1_i32 : i32
    %1 = arith.addi %0, %arg1 : i32
    %c0_i32 = arith.constant 0 : i32
    %2 = arith.minsi %1, %c0_i32 : i32
    %c0_i32_0 = arith.constant 0 : i32
    %c0_i32_1 = arith.constant 0 : i32
    %c0_i32_2 = arith.constant 0 : i32
    return %c0_i32_0, %2, %c0_i32_1 : i32, i32, i32
  }
  func.func @transform_1(%arg0: i32, %arg1: i32) -> (i32, i32) {
    %c0_i32 = arith.constant 0 : i32
    %c0_i32_0 = arith.constant 0 : i32
    %c0_i32_1 = arith.constant 0 : i32
    return %c0_i32, %c0_i32_0 : i32, i32
  }
  func.func @transform_2(%arg0: i32, %arg1: i32) -> (i32, i32) {
    %c0_i32 = arith.constant 0 : i32
    %c0_i32_0 = arith.constant 0 : i32
    %c0_i32_1 = arith.constant 0 : i32
    return %c0_i32, %c0_i32_0 : i32, i32
  }
  func.func @transform_3(%arg0: i32, %arg1: i32) -> (i32, i32) {
    %c0_i32 = arith.constant 0 : i32
    %c0_i32_0 = arith.constant 0 : i32
    %c0_i32_1 = arith.constant 0 : i32
    return %c0_i32, %c0_i32_0 : i32, i32
  }
  func.func @transform_4(%arg0: i32, %arg1: i32) -> (i32, i32) {
    %c0_i32 = arith.constant 0 : i32
    %c0_i32_0 = arith.constant 0 : i32
    %c0_i32_1 = arith.constant 0 : i32
    return %c0_i32, %c0_i32_0 : i32, i32
  }
  func.func @transform_5(%arg0: i32, %arg1: i32) -> (i32, i32, i32) {
    %c0_i32 = arith.constant 0 : i32
    %c0_i32_0 = arith.constant 0 : i32
    %c0_i32_1 = arith.constant 0 : i32
    return %arg0, %c0_i32, %c0_i32_0 : i32, i32, i32
  }
}

</mosaic_0001>

<bundles_post_ra>
// kernel: tpu_custom_call.1
= control target key start
LH: loop header
LB: loop body
LE: loop exit
PB: predicated region body
PF: predicated region fallthrough
CT: control target
= control target key end

     0   :  { %vm70_vm0 = vcmask 1044480   ;;  %v371_v3 = vmov 0.0|0.0   ;;  %vm52_vm1 = vcmask 57344   ;;  %v372_v6 = vmov 0.0   ;;  %s449_s0 = inlined_call_operand.vmem [shape: f32[2,8,29], index: 0, kind: input, shape index: {}]   ;;  %s450_s1 = inlined_call_operand.vmem [shape: f32[29,15], index: 1, kind: input, shape index: {}]   ;;  %s451_s2 = inlined_call_operand.vmem [shape: f32[1,15], index: 2, kind: input, shape index: {}]   ;;  %s452_s3 = inlined_call_operand.vmem [shape: f32[15,8], index: 3, kind: input, shape index: {}]   ;;  %s453_s4 = inlined_call_operand.vmem [shape: f32[1,8], index: 4, kind: input, shape index: {}]   ;;  %s454_s5 = inlined_call_operand.hbm [shape: f32[1,1,8], index: 5, kind: output, shape index: {}]  }
   0x1   :  { %v55_v0 = vld [vmem:[%s450_s1] sm:$0xff]  ;;  %v56_v1 = vld [vmem:[%s450_s1 + $0x8] sm:$0xff]  ;;  %v57_v2 = vld [vmem:[%s450_s1 + $0x10] sm:$0xff]  ;;  %331 = vmatprep.subr.bf16.mxu0 %v371_v3  ;;  %338 = vmatprep.subr.bf16.mxu1 %v371_v3  ;;  %53 = vst.msk [vmem:[#allocation2] sm:$0x1] %vm52_vm1, %v372_v6  ;;  %vm373_vm2 = vmmov 0  }
   0x2   :  { %v332_v4 = vpack.c.bf16 %v56_v1, %v55_v0  ;;  %v58_v5 = vld [vmem:[%s450_s1 + $0x18] sm:$0x1f]  ;;  %321 = vmatprep.mubr.msk.f32.mxu0 %vm373_vm2, %v372_v6  ;;  %328 = vmatprep.mubr.msk.f32.mxu1 %vm373_vm2, %v372_v6 }
   0x3   :  { %10 = vsyncpa [#allocation4], 0  ;;  %v335_v7 = vpack.c.bf16 %v58_v5, %v57_v2  ;;  %vm374_vm3 = vmmov 1   ;;  %v54_v8 = vld [vmem:[%s449_s0] sm:$0xff]  ;;  %vm66_vm5 = vcmask 236544   ;;  %vm158_vm6 = vcmask 1046528  }
   0x4   :  { %333 = vmatpush3.bf16.msra.mxu0 %v332_v4  ;;  %vm336_vm4 = vmpackc.low %vm70_vm0, %vm374_vm3  ;;  %v145_v9 = vld [vmem:[%s452_s3] sm:$0xff]  ;;  %v146_v10 = vld [vmem:[%s452_s3 + $0x8] sm:$0x7f]  ;;  %vm154_vm8 = vcmask 121856   ;;  %vm242_vm9 = vcmask 64512  }
   0x5   :  { %334 = vmatprep.subr.bf16.mxu0 %v371_v3  ;;  %v339_v11 = vpack.c.bf16 %v146_v10, %v145_v9  ;;  %vm340_vm7 = vmpackc.low %vm158_vm6, %vm374_vm3  ;;  %v299_v12 = vld [vmem:[%s451_s2] ss:$0 sm:$0xff]  ;;  %s375_s2 = smov [#allocation3]  }
   0x6   :  { %v302_v17 = vld [vmem:[%s453_s4] ss:$0 sm:$0xff]  ;;  %s285_s3 = sshll.u32 %s375_s2, 4  ;;  %s286_s3 = int_to_ptr.vmem [resolvable:$true] %s285_s3 }
   0x7   :  { %341 = vmatpush3.bf16.msk.msra.mxu1 %vm340_vm7, %v339_v11  ;;  %s347_s4 = scalar_lea.vmem %s286_s3, 16  ;;  %s351_s9 = scalar_lea.vmem %s286_s3, 32 }
   0x8   :  { %337 = vmatpush3.bf16.msk.msra.mxu0 %vm336_vm4, %v335_v7  ;;  %v241_v28 = vld [vmem:[#allocation2] sm:$0x1]  ;;  %p348_p0 = scmp.ne.s32.totalorder %s286_s3, %s347_s4  ;;  %p352_p1 = scmp.lt.s32.totalorder %s286_s3, %s286_s3 }
   0x9   :  { %p353_p2 = scmp.lt.s32.totalorder %s351_s9, %s347_s4 }
   0xb   :  { %322 = vmatmul.mubr.msk.f32.vlgmr.msra.gmra.mrb[0].mxu0 %vm66_vm5, %v54_v8  ;;  %p354_p3 = por %p353_p2, %p352_p1 }
   0xd   :  { %p355_p4 = pnand %p354_p3, %p348_p0 }
  0xde   :  { %v140_v13 = vpop.f32.mrb[0].mxu0 }
  0xdf   :  { %v141_v14 = vadd.f32 %v299_v12, %v140_v13  ;;  %v323_v15 = vpop.f32.mrb[1].mxu0 }
  0xe1   :  { %v144_v16 = vmax.f32 %v141_v14, 0.0 }
  0xe3   :  { %329 = vmatmul.mubr.msk.f32.vlgmr.msra.gmra.mrb[0].mxu1 %vm154_vm8, %v144_v16 }
 0x1b6   :  { %v228_v18 = vpop.f32.mrb[0].mxu1 }
 0x1b7   :  { %v229_v19 = vadd.f32 %v302_v17, %v228_v18  ;;  %v330_v20 = vpop.f32.mrb[1].mxu1 }
 0x1b9   :  { %v232_v21 = vmax.f32 %v229_v19, 0.0 }
 0x1bb   :  { %v243_v22 = vsel %vm242_vm9, %v232_v21, 0.0 }
 0x1bc   :  { %v244_v23 = vrot.slane %v243_v22, 4 }
 0x1be   :  { %v245_v24 = vadd.f32 %v244_v23, %v243_v22 }
 0x1c0   :  { %v246_v25 = vrot.slane %v245_v24, 2 }
 0x1c2   :  { %v247_v26 = vadd.f32 %v246_v25, %v245_v24 }
 0x1c4   :  { %v248_v27 = vrot.slane %v247_v26, 1 }
 0x1c6   :  { %v249_v29 = vadd.f32 %v248_v27, %v247_v26 }
 0x1c8   :  { %v250_v30 = vadd.f32 %v249_v29, %v241_v28 }
 0x1ca   :  { %252 = vst.msk [vmem:[#allocation2] sm:$0x1] %vm52_vm1, %v250_v30 }
 0x1d1   :  { %v276_v31 = vld [vmem:[#allocation2] sm:$0x1] }
 0x1d2   :  { %278 = vst.msk [vmem:[#allocation3] sm:$0x1] %vm52_vm1, %v276_v31 }
 0x1d3   :  { %358 = shalt.err (!%p355_p4)
}
 0x1d4   :  { %s359_s12 = scalar_lea.hbm %s454_s5, 16 }
 0x1d5   :  { %p360_p5 = scmp.ne.s32.totalorder %s454_s5, %s359_s12  ;;  %p363_p6 = scmp.lt.u32.totalorder %s359_s12, %s454_s5 }
 0x1d7   :  { %p365_p7 = pnand %p363_p6, %p360_p5 }
 0x1d9   :  { %368 = shalt.err (!%p365_p7)
}
 0x1da   :  { %288 = dma.vmem_to_hbm [thread:$0]  %s286_s3, 16, %s454_s5, [#allocation4]  }
 0x1db   :  { %369 = dma.done.wait [#allocation4], 16  }
 0x1dc   :  { %370 = vsyncadd [#allocation4], 4294967280 }
 0x1dd   :  { %292 = vsyncpa [#allocation4], 1 }

</bundles_post_ra>
